<compile_context>
chip_gen: v7x
topology: tpu7x:2x2x1
jax: 0.10.0
libtpu: 0.0.40
codegen_flags: <defaults>
</compile_context>

<pallas_src>
import jax
import jax.numpy as jnp
from jax import lax
from jax.experimental import pallas as pl
from jax.experimental.pallas import tpu as pltpu


def _round_up(x, m):
    return ((x + m - 1) // m) * m


def _mlp_kernel(x_ref, w1_ref, b1_ref, w2_ref, b2_ref, o_ref):
    """One batch tile.

    x_ref  : (TILE_B, F)  activation tile (f32 or bf16), streamed per step
    w1_ref : (H, F)       layer-1 weight, PyTorch (out, in) layout, VMEM-resident
    b1_ref : (H, 1)       layer-1 bias as a column, VMEM-resident
    w2_ref : (H, 1)       layer-2 weight as a column, VMEM-resident
    b2_ref : (1,)         layer-2 bias, SMEM scalar
    o_ref  : (1, TILE_B)  lane-dense output row (batch on the lane axis)
    """
    # Layer 1 on the MXU, transposed: h_t[h, b] = sum_f w1[h, f] * x[b, f].
    # dot_general contracting dim 1 of both operands == w1 @ x.T ("trans_b").
    h_t = lax.dot_general(
        w1_ref[...], x_ref[...],
        dimension_numbers=(((1,), (1,)), ((), ())),
        preferred_element_type=jnp.float32,
    )                                                   # (H, TILE_B) f32
    h_t = jnp.maximum(h_t + b1_ref[...], 0.0)           # bias + ReLU (VPU, f32)

    # Layer 2 (50 -> 1): VPU multiply + sublane reduce; result is lane-dense.
    y = jnp.sum(h_t * w2_ref[...], axis=0, keepdims=True)   # (1, TILE_B)
    y = y + b2_ref[0]                                        # SMEM scalar bias
    o_ref[...] = y.astype(o_ref.dtype)


def medium_linear_net_forward(x, w1, b1, w2, b2, *, tile_b=512,
                              compute_dtype=jnp.float32):
    """Forward pass of medium_linear_net.

    x : (B, F) float32
    w1: (H, F), b1: (H,), w2: (1, H), b2: (1,)   -- PyTorch nn.Linear layouts.
    Returns (B, 1) float32.
    """
    B, F = x.shape
    H = w1.shape[0]

    # One-time, tiny parameter layout plumbing (wrapper side, outside kernel).
    w1_c = w1.astype(compute_dtype)                 # (H, F)
    b1_col = b1.reshape(H, 1).astype(jnp.float32)   # (H, 1)
    w2_col = w2.reshape(H, 1).astype(jnp.float32)   # (H, 1)
    b2_s = b2.reshape(1).astype(jnp.float32)        # (1,) -> SMEM

    # Batch tiling: lane axis needs multiples of 128.  Keep the tile small
    # enough that 2 (double-buffered) * TILE_B * F * itemsize stays well under
    # the scoped-VMEM budget even for large F.
    tile_b = max(128, int(tile_b))
    TILE_B = min(tile_b, _round_up(B, 128))
    B_pad = _round_up(B, TILE_B)
    x_c = x.astype(compute_dtype)
    if B_pad != B:
        x_c = jnp.pad(x_c, ((0, B_pad - B), (0, 0)))
    num_tiles = B_pad // TILE_B

    out_row = pl.pallas_call(
        _mlp_kernel,
        out_shape=jax.ShapeDtypeStruct((1, B_pad), jnp.float32),
        grid=(num_tiles,),
        in_specs=[
            pl.BlockSpec((TILE_B, F), lambda i: (i, 0)),        # x tile (streamed)
            pl.BlockSpec((H, F), lambda i: (0, 0)),             # w1 (VMEM-resident)
            pl.BlockSpec((H, 1), lambda i: (0, 0)),             # b1 (VMEM-resident)
            pl.BlockSpec((H, 1), lambda i: (0, 0)),             # w2 (VMEM-resident)
            pl.BlockSpec(memory_space=pltpu.MemorySpace.SMEM),  # b2 scalar
        ],
        out_specs=pl.BlockSpec((1, TILE_B), lambda i: (0, i)),  # lane-dense row
        compiler_params=pltpu.CompilerParams(
            # Independent batch tiles -> shard across v7x's 2 TCs; no-op on 1-TC gens.
            dimension_semantics=("parallel",),
            # Explicit scoped-VMEM budget (v5e default is only 16 MiB).
            vmem_limit_bytes=32 * 1024 * 1024,
        ),
    )(x_c, w1_c, b1_col, w2_col, b2_s)

    # (1, B_pad) -> (B, 1): pure layout plumbing outside the kernel.
    return out_row.reshape(B_pad, 1)[:B]


def init_params(key, num_features, hidden=50, out=1):
    """Deterministic init matching PyTorch nn.Linear shapes and init dist."""
    k1, k2, k3, k4 = jax.random.split(key, 4)
    bound1 = 1.0 / float(num_features) ** 0.5
    bound2 = 1.0 / float(hidden) ** 0.5
    w1 = jax.random.uniform(k1, (hidden, num_features), jnp.float32, -bound1, bound1)
    b1 = jax.random.uniform(k2, (hidden,), jnp.float32, -bound1, bound1)
    w2 = jax.random.uniform(k3, (out, hidden), jnp.float32, -bound2, bound2)
    b2 = jax.random.uniform(k4, (out,), jnp.float32, -bound2, bound2)
    return w1, b1, w2, b2


if __name__ == "__main__":
    key = jax.random.PRNGKey(0)
    kx, kp = jax.random.split(key)

    # Small but non-trivial: batch not a multiple of 128 (exercises padding),
    # tile_b=128 gives a 3-step batch grid.
    batch, num_features = 300, 32
    x = jax.random.normal(kx, (batch, num_features), jnp.float32)
    w1, b1, w2, b2 = init_params(kp, num_features)

    out = medium_linear_net_forward(x, w1, b1, w2, b2, tile_b=128)
    out = jax.block_until_ready(out)

    # Reference (same math as the PyTorch forward, PyTorch weight layouts).
    ref = jnp.maximum(x @ w1.T + b1[None, :], 0.0) @ w2.T + b2[None, :]
    assert out.shape == (batch, 1)
    assert jnp.allclose(out, ref, atol=1e-5, rtol=1e-5)

    print("KERNEL_OK")
</pallas_src>

<mosaic_0001>
module attributes {stable_mosaic.version = 11 : i64} {
  func.func @_mlp_kernel(%arg0: i32, %arg1: memref<128x32xf32, #tpu.memory_space<vmem>>, %arg2: memref<50x32xf32, #tpu.memory_space<vmem>>, %arg3: memref<50x1xf32, #tpu.memory_space<vmem>>, %arg4: memref<50x1xf32, #tpu.memory_space<vmem>>, %arg5: memref<1xf32, #tpu.memory_space<smem>>, %arg6: memref<1x128xf32, #tpu.memory_space<vmem>>) attributes {dimension_semantics = [#tpu.dimension_semantics<parallel>], iteration_bounds = array<i64: 3>, scalar_prefetch = 0 : i64, scratch_operands = 0 : i64, tpu.core_type = #tpu.core_type<tc>, window_params = [{transform_indices = @transform_0, window_bounds = array<i64: 128, 32>}, {pipeline_mode = #tpu.pipeline_mode<synchronous>, transform_indices = @transform_1, window_bounds = array<i64: 50, 32>}, {pipeline_mode = #tpu.pipeline_mode<synchronous>, transform_indices = @transform_2, window_bounds = array<i64: 50, 1>}, {pipeline_mode = #tpu.pipeline_mode<synchronous>, transform_indices = @transform_3, window_bounds = array<i64: 50, 1>}, {transform_indices = @transform_4, window_bounds = array<i64: 1>}, {transform_indices = @transform_5, window_bounds = array<i64: 1, 128>}]} {
    %c0 = arith.constant 0 : index
    %c0_0 = arith.constant 0 : index
    %0 = vector.load %arg2[%c0, %c0_0] : memref<50x32xf32, #tpu.memory_space<vmem>>, vector<50x32xf32>
    %c0_1 = arith.constant 0 : index
    %c0_2 = arith.constant 0 : index
    %1 = vector.load %arg1[%c0_1, %c0_2] : memref<128x32xf32, #tpu.memory_space<vmem>>, vector<128x32xf32>
    %cst = arith.constant dense<0.000000e+00> : vector<50x128xf32>
    %2 = tpu.matmul %0, %1, %cst {dimension_numbers = #tpu.dot_dimension_numbers<[1], [1], [0], [0], [0, 0, 1, 0], [], []>} : vector<50x32xf32>, vector<128x32xf32>, vector<50x128xf32> -> vector<50x128xf32>
    %c0_3 = arith.constant 0 : index
    %c0_4 = arith.constant 0 : index
    %3 = vector.load %arg3[%c0_3, %c0_4] : memref<50x1xf32, #tpu.memory_space<vmem>>, vector<50x1xf32>
    %4 = vector.broadcast %3 : vector<50x1xf32> to vector<50x128xf32>
    %5 = arith.addf %2, %4 : vector<50x128xf32>
    %cst_5 = arith.constant 0.000000e+00 : f32
    %6 = vector.broadcast %cst_5 : f32 to vector<50x128xf32>
    %7 = arith.maximumf %5, %6 : vector<50x128xf32>
    %c0_6 = arith.constant 0 : index
    %c0_7 = arith.constant 0 : index
    %8 = vector.load %arg4[%c0_6, %c0_7] : memref<50x1xf32, #tpu.memory_space<vmem>>, vector<50x1xf32>
    %9 = vector.broadcast %8 : vector<50x1xf32> to vector<50x128xf32>
    %10 = arith.mulf %7, %9 : vector<50x128xf32>
    %cst_8 = arith.constant dense<0.000000e+00> : vector<128xf32>
    %11 = vector.multi_reduction <add>, %10, %cst_8 [0] : vector<50x128xf32> to vector<128xf32>
    %12 = vector.shape_cast %11 : vector<128xf32> to vector<1x128xf32>
    %c0_9 = arith.constant 0 : index
    %13 = memref.load %arg5[%c0_9] : memref<1xf32, #tpu.memory_space<smem>>
    %14 = vector.broadcast %13 : f32 to vector<1x128xf32>
    %15 = arith.addf %12, %14 : vector<1x128xf32>
    %c0_10 = arith.constant 0 : index
    %c0_11 = arith.constant 0 : index
    %16 = vector.load %arg6[%c0_10, %c0_11] : memref<1x128xf32, #tpu.memory_space<vmem>>, vector<1x128xf32>
    tpu.vector_store %arg6[%c0_10, %c0_11], %15 {strides = array<i32>} : memref<1x128xf32, #tpu.memory_space<vmem>>, vector<1x128xf32>,
    return
  }
  func.func @transform_0(%arg0: i32) -> (i32, i32) {
    %c0_i32 = arith.constant 0 : i32
    %c0_i32_0 = arith.constant 0 : i32
    return %arg0, %c0_i32 : i32, i32
  }
  func.func @transform_1(%arg0: i32) -> (i32, i32) {
    %c0_i32 = arith.constant 0 : i32
    %c0_i32_0 = arith.constant 0 : i32
    %c0_i32_1 = arith.constant 0 : i32
    return %c0_i32, %c0_i32_0 : i32, i32
  }
  func.func @transform_2(%arg0: i32) -> (i32, i32) {
    %c0_i32 = arith.constant 0 : i32
    %c0_i32_0 = arith.constant 0 : i32
    %c0_i32_1 = arith.constant 0 : i32
    return %c0_i32, %c0_i32_0 : i32, i32
  }
  func.func @transform_3(%arg0: i32) -> (i32, i32) {
    %c0_i32 = arith.constant 0 : i32
    %c0_i32_0 = arith.constant 0 : i32
    %c0_i32_1 = arith.constant 0 : i32
    return %c0_i32, %c0_i32_0 : i32, i32
  }
  func.func @transform_4(%arg0: i32) -> i32 {
    %c0_i32 = arith.constant 0 : i32
    %c0_i32_0 = arith.constant 0 : i32
    return %c0_i32 : i32
  }
  func.func @transform_5(%arg0: i32) -> (i32, i32) {
    %c0_i32 = arith.constant 0 : i32
    %c0_i32_0 = arith.constant 0 : i32
    return %c0_i32, %arg0 : i32, i32
  }
}

</mosaic_0001>

<bundles_post_ra>
// kernel: tpu_custom_call.1
= control target key start
LH: loop header
LB: loop body
LE: loop exit
PB: predicated region body
PF: predicated region fallthrough
CT: control target
= control target key end

     0   :  { %s1160_s0 = inlined_call_operand.vmem [shape: f32[384,32], index: 0, kind: input, shape index: {}]   ;;  %s1161_s1 = inlined_call_operand.vmem [shape: f32[50,32], index: 1, kind: input, shape index: {}]   ;;  %s1162_s2 = inlined_call_operand.vmem [shape: f32[50,1], index: 2, kind: input, shape index: {}]   ;;  %s1163_s3 = inlined_call_operand.vmem [shape: f32[50,1], index: 3, kind: input, shape index: {}]   ;;  %s1164_s4 = inlined_call_operand.<no memory space> [shape: f32[1], index: 4, kind: input, shape index: {}]   ;;  %s1165_s5 = inlined_call_operand.hbm [shape: f32[1,384], index: 5, kind: output, shape index: {}]  }
   0x1   :  { %10 = sst [smem:[#allocation2]] %s1164_s4 }
   0x2   :  { %11 = vsyncpa [#allocation4], 0 }
   0x3   :  { %13 = vsyncpa [#allocation4 + $0x1], 0  ;;  %s905_s20 = smov 0   ;;  %s907_s21 = smov 0  }
   0x4   :  { %s909_s22 = smov 0   ;;  %s911_s23 = smov 0  }
   0x5 LB: > { %s601_s4 = sadd.s32 4294967295, %s865_s23   ;;  %s602_s24 = sadd.s32 4294967294, %s865_s23   ;;  %s865_s23 = sphi %s911_s23, %s1173_s23   ;;  %s861_s22 = sphi %s909_s22, %s1172_s22   ;;  %s857_s21 = sphi %s907_s21, %s1171_s21   ;;  %s853_s20 = sphi %s905_s20, %s1170_s20  }
   0x6   : > { %s928_s25 = sadd.s32 1, %s865_s23   ;;  %s136_s26 = sadd.s32 1, %s861_s22 }
   0x7   : > { %s133_s27 = ssub.s32 %s865_s23, %s928_s25  ;;  %p146_p0 = scmp.ne.s32.totalorder %s861_s22, %s857_s21 }
   0x8   : > { %p134_p1 = scmp.eq.s32.totalorder %s133_s27, 0  ;;  %p147_p2 = scmp.eq.s32.totalorder %s601_s4, 2 }
   0x9   : > { %p152_p3 = scmp.ne.s32.totalorder %s857_s21, %s853_s20  ;;  %p153_p4 = scmp.eq.s32.totalorder %s602_s24, 2 }
   0xa   : > { %s938_s28 = scalar_select %p134_p1, %s861_s22, %s136_s26  }
   0xb   : > { %p940_p5 = por %p147_p2, %p146_p0  ;;  %p944_p6 = por %p153_p4, %p152_p3 }
   0xc   : > { %p605_p7 = scmp.ge.s32.totalorder %s865_s23, 1  ;;  %p192_p8 = scmp.lt.s32.totalorder %s865_s23, 4 }
   0xe   : > { %p193_p9 = pnand %p605_p7, %p192_p8 }
   0xf   : > { %s950_s6 = sshll.u32 (!%p193_p9), %s601_s4, 4  ;;  %v867_v0 = vmov (!%p193_p9), 0.0|0.0   ;;  %vm868_vm0 = vmmov (!%p193_p9), 0   ;;  %v869_v1 = vmov (!%p193_p9), 0.0   ;;  %v870_v2 = vmov (!%p193_p9), 0   ;;  %v248_v3 = vld [vmem:[%s1162_s2] sm:$0xff] (!%p193_p9) }
  0x10   : > { %196 = sbr.rel (%p193_p9) target bundleno = 359 (0x167), region = 40  ;;  %710 = vmatprep.subr.bf16.mxu0 (!%p193_p9), %v867_v0  ;;  %742 = vmatprep.subr.bf16.mxu1 (!%p193_p9), %v867_v0  ;;  %p220_p10 = scmp.lt.s32.totalorder (!%p193_p9), %s950_s6, 47  ;;  %v250_v4 = vld [vmem:[%s1162_s2 + $0x10] sm:$0xff] (!%p193_p9)  ;;  %vm290_vm1 = vcmask (!%p193_p9), 261120   ;;  %v249_v5 = vld [vmem:[%s1162_s2 + $0x8] sm:$0xff] (!%p193_p9)  ;;  %v251_v6 = vld [vmem:[%s1162_s2 + $0x18] sm:$0xff] (!%p193_p9) }
  0x11   : > { %689 = vmatprep.mubr.msk.f32.mxu0 (!%p193_p9), %vm868_vm0, %v869_v1  ;;  %701 = vmatprep.mubr.msk.f32.mxu1 (!%p193_p9), %vm868_vm0, %v869_v1  ;;  %vm981_vm2 = vmpackc.low (!%p193_p9), %vm290_vm1, %vm290_vm1  ;;  %v467_v11 = vld [vmem:[%s1163_s3] sm:$0xff] (!%p193_p9)  ;;  %v468_v12 = vld [vmem:[%s1163_s3 + $0x8] sm:$0xff] (!%p193_p9)  ;;  %vm521_vm3 = vcmask (!%p193_p9), 1041408   ;;  %s530_s24 = sld [smem:[#allocation2]] (!%p193_p9)  ;;  %s217_s26 = sand.u32 (!%p193_p9), 1, %s857_s21  }
  0x12   : > { %801 = vset.pattern.permute.xlu0 (!%p193_p9), %v870_v2  ;;  %802 = vset.pattern.permute.xlu1 (!%p193_p9), %v870_v2  ;;  %v252_v15 = vld [vmem:[%s1162_s2 + $0x20] sm:$0xff] (!%p193_p9)  ;;  %v469_v16 = vld [vmem:[%s1163_s3 + $0x10] sm:$0xff] (!%p193_p9)  ;;  %v253_v18 = vld [vmem:[%s1162_s2 + $0x28] sm:$0xff] (!%p193_p9)  ;;  %s218_s27 = scalar_lea.vmem (!%p193_p9), [#allocation3], %s217_s26  ;;  %s1118_s10 = scalar_lea.hbm (!%p193_p9), %s1165_s5, %s950_s6 }
  0x13   : > { %257 = vperm.xlu0 (!%p193_p9), %801, %v248_v3   ;;  %267 = vperm.xlu1 (!%p193_p9), %802, %v250_v4   ;;  %v470_v19 = vld [vmem:[%s1163_s3 + $0x18] sm:$0xff] (!%p193_p9)  ;;  %v254_v22 = vld [vmem:[%s1162_s2 + $0x30] sm:$0x3] (!%p193_p9)  ;;  %v471_v23 = vld [vmem:[%s1163_s3 + $0x20] sm:$0xff] (!%p193_p9) }
  0x14   : > { %v472_v25 = vld [vmem:[%s1163_s3 + $0x28] sm:$0xff] (!%p193_p9)  ;;  %v473_v26 = vld [vmem:[%s1163_s3 + $0x30] sm:$0x3] (!%p193_p9)  ;;  %v225_v42 = vld [vmem:[%s1161_s1] sm:$0xff] (!%p193_p9) }
  0x15   : > { %v229_v43 = vld [vmem:[%s1161_s1 + $0x20] sm:$0xff] (!%p193_p9)  ;;  %v226_v44 = vld [vmem:[%s1161_s1 + $0x8] sm:$0xff] (!%p193_p9)  ;;  %v227_v46 = vld [vmem:[%s1161_s1 + $0x10] sm:$0xff] (!%p193_p9) }
  0x16   : > { %v230_v45 = vld [vmem:[%s1161_s1 + $0x28] sm:$0xff] (!%p193_p9)  ;;  %v231_v47 = vld [vmem:[%s1161_s1 + $0x30] sm:$0x3] (!%p193_p9)  ;;  %v228_v48 = vld [vmem:[%s1161_s1 + $0x18] sm:$0xff] (!%p193_p9) }
  0x17   : > { %s221_s7 = scalar_select %p220_p10, %s950_s6, 47  ;;  %262 = vperm.xlu0 %801, %v249_v5   ;;  %272 = vperm.xlu1 %802, %v251_v6  }
  0x19   : > { %s607_s12 = sshll.u32 %s221_s7, 3  ;;  %s547_s7 = sshll.u32 %s218_s27, 4  ;;  %s1120_s7 = int_to_ptr.vmem [resolvable:$true] %s547_s7 }
  0x1a   : > { %s975_s19 = scalar_lea.vmem %s1160_s0, %s607_s12  ;;  %s803_s11 = scalar_lea.vmem %s1120_s7, 16 }
  0x1b   : > { %v232_v7 = vld [vmem:[%s975_s19] sm:$0xff]  ;;  %v233_v8 = vld [vmem:[%s975_s19 + $0x8] sm:$0xff]  ;;  %v234_v13 = vld [vmem:[%s975_s19 + $0x10] sm:$0xff]  ;;  %476 = vperm.xlu0 %801, %v467_v11   ;;  %481 = vperm.xlu1 %802, %v468_v12   ;;  %p804_p11 = scmp.ne.s32.totalorder %s1120_s7, %s803_s11  ;;  %s871_s12 = smov [#allocation3]  }
  0x1c   : > { %v711_v10 = vpack.c.bf16 %v233_v8, %v232_v7  ;;  %v235_v14 = vld [vmem:[%s975_s19 + $0x18] sm:$0xff]  ;;  %v236_v20 = vld [vmem:[%s975_s19 + $0x20] sm:$0xff]  ;;  %v237_v21 = vld [vmem:[%s975_s19 + $0x28] sm:$0xff]  ;;  %s807_s13 = sshll.u32 %s871_s12, 4  ;;  %s808_s13 = int_to_ptr.vmem [resolvable:$false] %s807_s13 }
  0x1d   : > { %v715_v17 = vpack.c.bf16 %v235_v14, %v234_v13  ;;  %v719_v24 = vpack.c.bf16 %v237_v21, %v236_v20  ;;  %v238_v27 = vld [vmem:[%s975_s19 + $0x30] sm:$0xff]  ;;  %v239_v28 = vld [vmem:[%s975_s19 + $0x38] sm:$0xff]  ;;  %v240_v30 = vld [vmem:[%s975_s19 + $0x40] sm:$0xff]  ;;  %p805_p12 = pnand %p804_p11, %p940_p5  ;;  %s809_s14 = scalar_lea.vmem %s808_s13, 32 }
  0x1e   : > { %713 = vmatpush3.bf16.xpose.msk.msra.mxu0 %vm981_vm2, %v711_v10  ;;  %750 = vmatpush3.bf16.xpose.msk.msra.mxu1 %vm981_vm2, %v711_v10  ;;  %v723_v29 = vpack.c.bf16 %v239_v28, %v238_v27  ;;  %v241_v31 = vld [vmem:[%s975_s19 + $0x48] sm:$0xff]  ;;  %v242_v33 = vld [vmem:[%s975_s19 + $0x50] sm:$0xff]  ;;  %v243_v34 = vld [vmem:[%s975_s19 + $0x58] sm:$0xff]  ;;  %p810_p0 = scmp.lt.s32.totalorder %s1120_s7, %s808_s13  ;;  %p811_p1 = scmp.lt.s32.totalorder %s809_s14, %s803_s11 }
  0x1f   : > { %714 = vmatprep.subr.bf16.mxu0 %v867_v0  ;;  %743 = vmatprep.subr.bf16.mxu1 %v867_v0  ;;  %v727_v32 = vpack.c.bf16 %v241_v31, %v240_v30  ;;  %v731_v35 = vpack.c.bf16 %v243_v34, %v242_v33  ;;  %v244_v36 = vld [vmem:[%s975_s19 + $0x60] sm:$0xff]  ;;  %v245_v37 = vld [vmem:[%s975_s19 + $0x68] sm:$0xff]  ;;  %v246_v39 = vld [vmem:[%s975_s19 + $0x70] sm:$0xff]  ;;  %p806_p13 = pneg %p805_p12 }
  0x20   : > { %277 = vperm.xlu0 %801, %v252_v15   ;;  %486 = vperm.xlu1 %802, %v469_v16   ;;  %v735_v38 = vpack.c.bf16 %v245_v37, %v244_v36  ;;  %v247_v40 = vld [vmem:[%s975_s19 + $0x78] sm:$0xff]  ;;  %s535_s19 = scalar_lea.sflag [#allocation4], %s217_s26  ;;  %p812_p2 = por %p811_p1, %p810_p0 }
  0x21   : > { %v739_v41 = vpack.c.bf16 %v247_v40, %v246_v39 }
  0x22   : > { %p813_p3 = pnand %p812_p2, %p806_p13 }
  0x24   : > { %282 = vperm.xlu0 %801, %v253_v18   ;;  %491 = vperm.xlu1 %802, %v470_v19  }
  0x26   : > { %717 = vmatpush3.bf16.xpose.msk.msra.mxu0 %vm981_vm2, %v715_v17  ;;  %751 = vmatpush3.bf16.xpose.msk.msra.mxu1 %vm981_vm2, %v715_v17 }
  0x27   : > { %718 = vmatprep.subr.bf16.mxu0 %v867_v0  ;;  %744 = vmatprep.subr.bf16.mxu1 %v867_v0 }
  0x28   : > { %287 = vperm.xlu0 %801, %v254_v22   ;;  %496 = vperm.xlu1 %802, %v471_v23  }
  0x2c   : > { %501 = vperm.xlu0 %801, %v472_v25   ;;  %506 = vperm.xlu1 %802, %v473_v26  }
  0x2e   : > { %721 = vmatpush3.bf16.xpose.msk.msra.mxu0 %vm981_vm2, %v719_v24  ;;  %752 = vmatpush3.bf16.xpose.msk.msra.mxu1 %vm981_vm2, %v719_v24 }
  0x2f   : > { %722 = vmatprep.subr.bf16.mxu0 %v867_v0  ;;  %745 = vmatprep.subr.bf16.mxu1 %v867_v0 }
  0x36   : > { %725 = vmatpush3.bf16.xpose.msk.msra.mxu0 %vm981_vm2, %v723_v29  ;;  %753 = vmatpush3.bf16.xpose.msk.msra.mxu1 %vm981_vm2, %v723_v29 }
  0x37   : > { %726 = vmatprep.subr.bf16.mxu0 %v867_v0  ;;  %746 = vmatprep.subr.bf16.mxu1 %v867_v0 }
  0x3e   : > { %729 = vmatpush3.bf16.xpose.msk.msra.mxu0 %vm981_vm2, %v727_v32  ;;  %754 = vmatpush3.bf16.xpose.msk.msra.mxu1 %vm981_vm2, %v727_v32 }
  0x3f   : > { %730 = vmatprep.subr.bf16.mxu0 %v867_v0  ;;  %747 = vmatprep.subr.bf16.mxu1 %v867_v0 }
  0x46   : > { %733 = vmatpush3.bf16.xpose.msk.msra.mxu0 %vm981_vm2, %v731_v35  ;;  %755 = vmatpush3.bf16.xpose.msk.msra.mxu1 %vm981_vm2, %v731_v35 }
  0x47   : > { %734 = vmatprep.subr.bf16.mxu0 %v867_v0  ;;  %748 = vmatprep.subr.bf16.mxu1 %v867_v0 }
  0x4e   : > { %737 = vmatpush3.bf16.xpose.msk.msra.mxu0 %vm981_vm2, %v735_v38  ;;  %756 = vmatpush3.bf16.xpose.msk.msra.mxu1 %vm981_vm2, %v735_v38 }
  0x4f   : > { %738 = vmatprep.subr.bf16.mxu0 %v867_v0  ;;  %749 = vmatprep.subr.bf16.mxu1 %v867_v0 }
  0x56   : > { %741 = vmatpush3.bf16.xpose.msk.msra.mxu0 %vm981_vm2, %v739_v41  ;;  %757 = vmatpush3.bf16.xpose.msk.msra.mxu1 %vm981_vm2, %v739_v41 }
  0x5d   : > { %690 = vmatmul.mubr.msk.f32.vlgmr.msra.gmra.mrb[0].mxu0 %vm290_vm1, %v225_v42  ;;  %702 = vmatmul.mubr.msk.f32.vlgmr.msra.gmra.mrb[0].mxu1 %vm290_vm1, %v229_v43 }
  0x5e   : > { %692 = vmatprep.mubr.msk.f32.mxu0 %vm868_vm0, %v869_v1  ;;  %704 = vmatprep.mubr.msk.f32.mxu1 %vm868_vm0, %v869_v1 }
  0x61   : > { %693 = vmatmul.mubr.msk.f32.gmra.mrb[2].mxu0 %vm290_vm1, %v226_v44  ;;  %705 = vmatmul.mubr.msk.f32.gmra.mrb[2].mxu1 %vm290_vm1, %v230_v45 }
  0x62   : > { %695 = vmatprep.mubr.msk.f32.mxu0 %vm868_vm0, %v869_v1  ;;  %707 = vmatprep.mubr.msk.f32.mxu1 %vm868_vm0, %v869_v1 }
  0x65   : > { %696 = vmatmul.mubr.msk.f32.gmra.mrb[4].mxu0 %vm290_vm1, %v227_v46  ;;  %708 = vmatmul.mubr.msk.f32.gmra.mrb[4].mxu1 %vm290_vm1, %v231_v47  ;;  %v531_v46 = vstv %s530_s24 }
  0x66   : > { %698 = vmatprep.mubr.msk.f32.mxu0 %vm868_vm0, %v869_v1 }
  0x69   : > { %699 = vmatmul.mubr.msk.f32.gmra.mrb[6].mxu0 %vm290_vm1, %v228_v48 }
  0x92   : > { %v258_v49 = vpop.permute.xlu0 %257  ;;  %v268_v50 = vpop.permute.xlu1 %267 }
  0x96   : > { %v263_v51 = vpop.permute.xlu0 %262  ;;  %v273_v52 = vpop.permute.xlu1 %272 }
  0x9a   : > { %v477_v53 = vpop.permute.xlu0 %476  ;;  %v482_v54 = vpop.permute.xlu1 %481 }
  0x9f   : > { %v278_v55 = vpop.permute.xlu0 %277  ;;  %v487_v56 = vpop.permute.xlu1 %486 }
  0xa3   : > { %v283_v62 = vpop.permute.xlu0 %282  ;;  %v492_v5 = vpop.permute.xlu1 %491 }
  0xa7   : > { %v288_v14 = vpop.permute.xlu0 %287  ;;  %v497_v20 = vpop.permute.xlu1 %496 }
  0xab   : > { %v507_v31 = vpop.permute.xlu1 %506  ;;  %v502_v34 = vpop.permute.xlu0 %501 }
 0x130   : > { %v426_v57 = vpop.f32.mrb[0].mxu0  ;;  %v446_v58 = vpop.f32.mrb[0].mxu1 }
 0x131   : > { %v427_v59 = vadd.f32 %v426_v57, %v258_v49  ;;  %v691_v60 = vpop.f32.mrb[1].mxu0  ;;  %v703_v61 = vpop.f32.mrb[1].mxu1  ;;  %v447_v15 = vadd.f32 %v446_v58, %v278_v55 }
 0x133   : > { %v460_v1 = vmax.f32 %v427_v59, 0.0  ;;  %v464_v25 = vmax.f32 %v447_v15, 0.0 }
 0x134   : > { %v431_v63 = vpop.f32.mrb[2].mxu0  ;;  %v451_v0 = vpop.f32.mrb[2].mxu1 }
 0x135   : > { %v432_v2 = vadd.f32 %v431_v63, %v263_v51  ;;  %v694_v3 = vpop.f32.mrb[3].mxu0  ;;  %v706_v4 = vpop.f32.mrb[3].mxu1  ;;  %v509_v9 = vmul.f32 %v477_v53, %v460_v1  ;;  %v452_v21 = vadd.f32 %v451_v0, %v283_v62  ;;  %v513_v32 = vmul.f32 %v497_v20, %v464_v25 }
 0x137   : > { %v461_v6 = vmax.f32 %v432_v2, 0.0  ;;  %v465_v29 = vmax.f32 %v452_v21, 0.0 }
 0x138   : > { %v436_v7 = vpop.f32.mrb[4].mxu0  ;;  %v456_v8 = vpop.f32.mrb[4].mxu1 }
 0x139   : > { %v510_v10 = vmul.f32 %v482_v54, %v461_v6  ;;  %v437_v11 = vadd.f32 %v436_v7, %v268_v50  ;;  %v697_v12 = vpop.f32.mrb[5].mxu0  ;;  %v709_v13 = vpop.f32.mrb[5].mxu1  ;;  %v457_v18 = vadd.f32 %v456_v8, %v288_v14  ;;  %v514_v36 = vmul.f32 %v502_v34, %v465_v29 }
 0x13b   : > { %v516_v16 = vadd.f32 %v510_v10, %v509_v9  ;;  %v462_v17 = vmax.f32 %v437_v11, 0.0  ;;  %v466_v28 = vmax.f32 %v457_v18, 0.0 }
 0x13c   : > { %v441_v19 = vpop.f32.mrb[6].mxu0 }
 0x13d   : > { %v511_v22 = vmul.f32 %v487_v56, %v462_v17  ;;  %v442_v23 = vadd.f32 %v441_v19, %v273_v52  ;;  %v700_v24 = vpop.f32.mrb[7].mxu0  ;;  %v515_v35 = vmul.f32 %v507_v31, %v466_v28 }
 0x13f   : > { %v517_v26 = vadd.f32 %v516_v16, %v511_v22  ;;  %v463_v27 = vmax.f32 %v442_v23, 0.0  ;;  %v522_v39 = vsel %vm521_vm3, %v515_v35, 0.0 }
 0x141   : > { %v512_v30 = vmul.f32 %v492_v5, %v463_v27 }
 0x143   : > { %v518_v33 = vadd.f32 %v517_v26, %v512_v30 }
 0x145   : > { %v519_v37 = vadd.f32 %v518_v33, %v513_v32 }
 0x147   : > { %v520_v38 = vadd.f32 %v519_v37, %v514_v36 }
 0x149   : > { %v523_v40 = vadd.f32 %v522_v39, %v520_v38 }
 0x14b   : > { %v524_v41 = vrot.slane %v523_v40, 4 }
 0x14d   : > { %v525_v42 = vadd.f32 %v524_v41, %v523_v40 }
 0x14f   : > { %v526_v43 = vrot.slane %v525_v42, 2 }
 0x151   : > { %v527_v44 = vadd.f32 %v526_v43, %v525_v42 }
 0x153   : > { %v528_v45 = vrot.slane %v527_v44, 1 }
 0x155   : > { %v529_v47 = vadd.f32 %v528_v45, %v527_v44 }
 0x157   : > { %v532_v48 = vadd.f32 %v531_v46, %v529_v47 }
 0x159   : > { %533 = vst [vmem:[%s218_s27] sm:$0x1] %v532_v48 }
 0x15a   : > { %816 = shalt.err (!%p813_p3)
}
 0x15b   : > { %s817_s6 = scalar_lea.hbm %s1118_s10, 16  ;;  %s821_s17 = scalar_lea.hbm %s1165_s5, 48 }
 0x15c   : > { %p818_p4 = scmp.ne.s32.totalorder %s1118_s10, %s817_s6  ;;  %p822_p9 = scmp.lt.u32.totalorder %s1118_s10, %s1165_s5 }
 0x15d   : > { %p823_p10 = scmp.lt.u32.totalorder %s821_s17, %s817_s6  ;;  %p825_p12 = scmp.lt.u32.totalorder %s817_s6, %s1118_s10 }
 0x15e   : > { %p819_p7 = pnand %p818_p4, %p940_p5 }
 0x15f   : > { %p824_p11 = por %p823_p10, %p822_p9 }
 0x160   : > { %p820_p8 = pneg %p819_p7 }
 0x161   : > { %p826_p13 = por %p825_p12, %p824_p11 }
 0x163   : > { %p827_p0 = pnand %p826_p13, %p820_p8 }
 0x165   : > { %830 = shalt.err (!%p827_p0)
}
 0x166   : > { %758 = dma.vmem_to_hbm [thread:$0]  (%p940_p5), %s1120_s7, 16, %s1118_s10, %s535_s19  }
 0x167 PF: > { %p764_p1 = scmp.ge.s32.totalorder %s865_s23, 2  ;;  %s559_s24 = sand.u32 1, %s853_s20  }
 0x168   : > { %s560_s26 = scalar_lea.sflag [#allocation4], %s559_s24 }
 0x169   : > { %p761_p2 = pnand %p764_p1, %p944_p6 }
 0x16b   : > { %848 = dma.done.wait (!%p761_p2), %s560_s26, 16  }
 0x16c   : > { %850 = vsyncadd (!%p761_p2), %s560_s26, 4294967280  ;;  %p16_p3 = scmp.ge.s32.totalorder %s928_s25, 5   ;;  %s1170_s20 = smov %s857_s21 }
 0x16d   : > { %s1171_s21 = smov %s861_s22  ;;  %s1172_s22 = smov %s938_s28 }
 0x16e   : > { %s1173_s23 = smov %s928_s25  ;;  %18 = sbr.rel (!%p16_p3) target bundleno = 5 (0x5), region = 75 }
 0x175   :  { %564 = vsyncpa [#allocation4], 1 }
 0x176   :  { %566 = vsyncpa [#allocation4 + $0x1], 1 }

</bundles_post_ra>
